<compile_context>
chip_gen: v6e
topology: v6e:2x2x1
jax: 0.10.0
libtpu: 0.0.40
codegen_flags: <defaults>
</compile_context>

<pallas_src>
import jax
import jax.numpy as jnp
from jax.experimental import pallas as pl
from jax.experimental.pallas import tpu as pltpu

LANE = 128          # output (lane) width of every layer slab
K_ALIGN = 16        # sublane packing of bf16; K axis padded to this
_EPS = 1e-5
_OUT_NAMES = ("recons", "latents", "geneset_activities", "decoded_geneset_activities")


# ----------------------------------------------------------------------------
# Parameter construction (deterministic, synthetic; raw PyTorch-equivalent form)
# ----------------------------------------------------------------------------
def _linear_params(key, in_dim, out_dim):
    kw, kb = jax.random.split(key)
    bound = 1.0 / jnp.sqrt(in_dim)
    w = jax.random.uniform(kw, (in_dim, out_dim), jnp.float32, -bound, bound)
    b = jax.random.uniform(kb, (out_dim,), jnp.float32, -bound, bound)
    return w, b


def _bn_params(key, dim):
    k1, k2, k3, k4 = jax.random.split(key, 4)
    gamma = 1.0 + 0.1 * jax.random.normal(k1, (dim,), jnp.float32)
    beta = 0.1 * jax.random.normal(k2, (dim,), jnp.float32)
    mean = 0.1 * jax.random.normal(k3, (dim,), jnp.float32)
    var = jax.random.uniform(k4, (dim,), jnp.float32, 0.5, 1.5)
    return jnp.stack([gamma, beta, mean, var], axis=0)  # (4, dim)


def init_geneset_ae_params(key, input_dim, n_genesets, hidden_dims, latent_dim,
                           adjacency):
    keys = jax.random.split(key, 32)
    ki = iter(keys)
    p = {}

    # geneset encoder: SparseLinear(input_dim -> n_genesets), mask = adjacency
    w, b = _linear_params(next(ki), input_dim, n_genesets)
    p["gs_enc_w"] = w * adjacency          # (input_dim, n_genesets)
    p["gs_enc_b"] = b

    # encoder
    p["enc_bn0"] = _bn_params(next(ki), n_genesets)
    p["enc_lin"] = []
    p["enc_bn"] = []
    dims = [n_genesets] + list(hidden_dims)
    for i in range(len(hidden_dims)):
        p["enc_lin"].append(_linear_params(next(ki), dims[i], dims[i + 1]))
        p["enc_bn"].append(_bn_params(next(ki), dims[i + 1]))
    p["enc_out"] = _linear_params(next(ki), hidden_dims[-1], latent_dim)
    p["enc_bn_latent"] = _bn_params(next(ki), latent_dim)

    # decoder
    p["dec_lin0"] = _linear_params(next(ki), latent_dim, hidden_dims[-1])
    p["dec_mid"] = []
    p["dec_mid_bn"] = []
    for i in range(len(hidden_dims) - 1):
        din = hidden_dims[-1 - i]
        dout = hidden_dims[-2 - i]
        p["dec_mid"].append(_linear_params(next(ki), din, dout))
        p["dec_mid_bn"].append(_bn_params(next(ki), dout))
    p["dec_out"] = _linear_params(next(ki), hidden_dims[0], n_genesets)

    # geneset decoder: BN(n_genesets) + SparseLinear(n_genesets -> input_dim)
    p["gs_dec_bn"] = _bn_params(next(ki), n_genesets)
    w, b = _linear_params(next(ki), n_genesets, input_dim)
    p["gs_dec_w"] = w * adjacency.T        # (n_genesets, input_dim)
    p["gs_dec_b"] = b
    return p


# ----------------------------------------------------------------------------
# Static prep: fold BN everywhere possible, pack into two slabs.
# ----------------------------------------------------------------------------
def _bn_affine(bn, eps=_EPS):
    g, bt, mu, var = bn[0], bn[1], bn[2], bn[3]
    scale = g * jax.lax.rsqrt(var + eps)
    shift = bt - mu * scale
    return scale, shift


def _fold_affine(affine, w, b):
    """(x*scale + shift) @ W + b  ==  x @ (scale[:,None]*W) + (shift @ W + b)."""
    scale, shift = affine
    return scale[:, None] * w, shift @ w + b


def _round_up(n, m):
    return -(-n // m) * m


def prepare_fused(params, hidden_dims, mxu_dtype=jnp.bfloat16):
    """Returns (plan, w_slab, vec_slab).

    plan["layer_cfg"]: static per-layer dicts
        {k_off, k_len, bias_row, relu, aff_row, emit=(name, lane_off, width)|None}
    plan["out_plan"]:  [(name, lane_off, width)] in _OUT_NAMES order
    w_slab:   (sum_Kpad, 128) mxu_dtype — weights stacked along sublanes
    vec_slab: (16, 128) f32 — all biases + the latent-BN affine rows
    """
    nh = len(hidden_dims)
    layers = []  # (W f32 (kin,kout), b, relu, affine_or_None, emit_name_or_None)

    # 1) geneset encoder: masked linear + ReLU -> geneset_activities
    layers.append((params["gs_enc_w"], params["gs_enc_b"], True, None,
                   "geneset_activities"))

    # 2) encoder: each BN is folded into the Linear that consumes it
    w, b = _fold_affine(_bn_affine(params["enc_bn0"]), *params["enc_lin"][0])
    layers.append((w, b, True, None, None))
    for i in range(1, nh):
        w, b = _fold_affine(_bn_affine(params["enc_bn"][i - 1]),
                            *params["enc_lin"][i])
        layers.append((w, b, True, None, None))
    w, b = _fold_affine(_bn_affine(params["enc_bn"][nh - 1]), *params["enc_out"])
    # enc_bn_latent must stay in-kernel (its result is emitted as latents)
    layers.append((w, b, False, _bn_affine(params["enc_bn_latent"]), "latents"))

    # 3) decoder
    layers.append((params["dec_lin0"][0], params["dec_lin0"][1], True, None, None))
    for i in range(nh - 1):
        w, b = params["dec_mid"][i]
        if i > 0:
            w, b = _fold_affine(_bn_affine(params["dec_mid_bn"][i - 1]), w, b)
        layers.append((w, b, True, None, None))
    w, b = params["dec_out"]
    if nh >= 2:
        w, b = _fold_affine(_bn_affine(params["dec_mid_bn"][nh - 2]), w, b)
    layers.append((w, b, True, None, "decoded_geneset_activities"))

    # 4) geneset decoder: BN folded into the masked linear -> recons
    w, b = _fold_affine(_bn_affine(params["gs_dec_bn"]),
                        params["gs_dec_w"], params["gs_dec_b"])
    layers.append((w, b, False, None, "recons"))

    # ---- pack into two slabs --------------------------------------------
    w_blocks, vec_rows, layer_cfg = [], [], []
    emit_dims = {}
    k_off = 0
    for (w, b, relu, affine, emit) in layers:
        kin, kout = int(w.shape[0]), int(w.shape[1])
        assert kout <= LANE
        kpad = _round_up(kin, K_ALIGN)
        wp = jnp.zeros((kpad, LANE), jnp.float32).at[:kin, :kout].set(w)
        w_blocks.append(wp)

        bias_row = len(vec_rows)
        vec_rows.append(jnp.zeros((LANE,), jnp.float32).at[:kout].set(b))
        aff_row = None
        if affine is not None:
            scale, shift = affine
            aff_row = len(vec_rows)
            # identity affine on padded lanes keeps them exactly zero
            vec_rows.append(jnp.ones((LANE,), jnp.float32).at[:kout].set(scale))
            vec_rows.append(jnp.zeros((LANE,), jnp.float32).at[:kout].set(shift))

        if emit is not None:
            emit_dims[emit] = kout
        layer_cfg.append(dict(k_off=k_off, k_len=kpad, bias_row=bias_row,
                              relu=bool(relu), aff_row=aff_row, emit=emit))
        k_off += kpad

    # output lane packing: all four outputs share ONE (B, 128) slab
    assert set(emit_dims) == set(_OUT_NAMES)
    out_plan, off = [], 0
    for name in _OUT_NAMES:
        out_plan.append((name, off, emit_dims[name]))
        off += emit_dims[name]
    # TODO(synk): spill to a second output slab if combined widths exceed 128.
    assert off <= LANE, "packed output widths exceed one 128-lane slab"
    lane = {n: (o, wdt) for n, o, wdt in out_plan}
    for cfg in layer_cfg:
        if cfg["emit"] is not None:
            name = cfg["emit"]
            cfg["emit"] = (name, lane[name][0], lane[name][1])

    w_slab = jnp.concatenate(w_blocks, axis=0).astype(mxu_dtype)
    n_vec = _round_up(len(vec_rows), 8)
    vec_slab = jnp.zeros((n_vec, LANE), jnp.float32).at[:len(vec_rows)].set(
        jnp.stack(vec_rows, axis=0))

    plan = dict(layer_cfg=layer_cfg, out_plan=out_plan, k0=layer_cfg[0]["k_len"])
    return plan, w_slab, vec_slab


# ----------------------------------------------------------------------------
# Forward pass: ONE gridless pallas_call, 3 input DMAs, 1 output DMA.
# ----------------------------------------------------------------------------
def geneset_ae_forward(plan, w_slab, vec_slab, x):
    layer_cfg = plan["layer_cfg"]
    out_plan = plan["out_plan"]
    k0 = plan["k0"]

    B, in_dim = x.shape
    x = x.astype(jnp.float32)
    if in_dim < k0:                                # no-op when in_dim % 16 == 0
        x = jnp.pad(x, ((0, 0), (0, k0 - in_dim)))

    def kernel(x_ref, w_ref, vec_ref, out_ref):
        out_ref[...] = jnp.zeros_like(out_ref)
        h = x_ref[...]                              # (B, k0) f32
        for cfg in layer_cfg:
            w = w_ref[pl.ds(cfg["k_off"], cfg["k_len"]), :]     # (kpad, 128) bf16
            hk = h[:, :cfg["k_len"]].astype(w_ref.dtype)
            h = jnp.dot(hk, w, preferred_element_type=jnp.float32)
            r = cfg["bias_row"]
            h = h + vec_ref[r:r + 1, :]                          # f32 bias
            if cfg["relu"]:
                h = jnp.maximum(h, 0.0)
            if cfg["aff_row"] is not None:                       # latent BN only
                a = cfg["aff_row"]
                h = h * vec_ref[a:a + 1, :] + vec_ref[a + 1:a + 2, :]
            if cfg["emit"] is not None:
                _, off, width = cfg["emit"]
                out_ref[:, off:off + width] = h[:, :width]

    vmem = pl.BlockSpec(memory_space=pltpu.MemorySpace.VMEM)
    flops = 2 * B * LANE * sum(c["k_len"] for c in layer_cfg)
    bytes_acc = int(x.size * 4 + w_slab.size * w_slab.dtype.itemsize
                    + vec_slab.size * 4 + B * LANE * 4)
    out = pl.pallas_call(
        kernel,
        out_shape=jax.ShapeDtypeStruct((B, LANE), jnp.float32),
        in_specs=[vmem, vmem, vmem],
        out_specs=vmem,
        cost_estimate=pl.CostEstimate(flops=flops, transcendentals=0,
                                      bytes_accessed=bytes_acc),
    )(x, w_slab, vec_slab)

    return {name: out[:, off:off + width] for (name, off, width) in out_plan}


# ----------------------------------------------------------------------------
# Pure-JAX mirror of the fused/quantized compute (tight correctness check).
# ----------------------------------------------------------------------------
def fused_forward_ref(plan, w_slab, vec_slab, x):
    layer_cfg = plan["layer_cfg"]
    out_plan = plan["out_plan"]
    k0 = plan["k0"]
    x = x.astype(jnp.float32)
    if x.shape[1] < k0:
        x = jnp.pad(x, ((0, 0), (0, k0 - x.shape[1])))
    h = x
    emitted = {}
    for cfg in layer_cfg:
        w = w_slab[cfg["k_off"]:cfg["k_off"] + cfg["k_len"], :]
        hk = h[:, :cfg["k_len"]].astype(w_slab.dtype)
        h = jnp.dot(hk, w, preferred_element_type=jnp.float32)
        r = cfg["bias_row"]
        h = h + vec_slab[r:r + 1, :]
        if cfg["relu"]:
            h = jnp.maximum(h, 0.0)
        if cfg["aff_row"] is not None:
            a = cfg["aff_row"]
            h = h * vec_slab[a:a + 1, :] + vec_slab[a + 1:a + 2, :]
        if cfg["emit"] is not None:
            emitted[cfg["emit"][0]] = h
    return {name: emitted[name][:, :width] for (name, _, width) in out_plan}


# ----------------------------------------------------------------------------
# Pure-JAX reference (unfolded, f32) matching the PyTorch module semantics.
# ----------------------------------------------------------------------------
def _bn_ref(x, bn, eps=_EPS):
    g, bt, mu, var = bn[0], bn[1], bn[2], bn[3]
    return (x - mu) * jax.lax.rsqrt(var + eps) * g + bt


def geneset_ae_forward_ref(params, inputs, hidden_dims):
    gsa = jnp.maximum(inputs @ params["gs_enc_w"] + params["gs_enc_b"], 0.0)
    h = _bn_ref(gsa, params["enc_bn0"])
    for i in range(len(hidden_dims)):
        w, b = params["enc_lin"][i]
        h = _bn_ref(jnp.maximum(h @ w + b, 0.0), params["enc_bn"][i])
    w, b = params["enc_out"]
    latents = _bn_ref(h @ w + b, params["enc_bn_latent"])
    w, b = params["dec_lin0"]
    h = jnp.maximum(latents @ w + b, 0.0)
    for i in range(len(hidden_dims) - 1):
        w, b = params["dec_mid"][i]
        h = _bn_ref(jnp.maximum(h @ w + b, 0.0), params["dec_mid_bn"][i])
    w, b = params["dec_out"]
    dgsa = jnp.maximum(h @ w + b, 0.0)
    recons = _bn_ref(dgsa, params["gs_dec_bn"]) @ params["gs_dec_w"] + params["gs_dec_b"]
    return {"recons": recons, "latents": latents,
            "geneset_activities": gsa, "decoded_geneset_activities": dgsa}


# ----------------------------------------------------------------------------
if __name__ == "__main__":
    # Small, module-consistent shapes.
    batch = 8
    input_dim = 32
    n_genesets = 16          # = adjacency.shape[1]
    hidden_dims = [64, 48]
    latent_dim = 32

    key = jax.random.PRNGKey(0)
    k_adj, k_par, k_x = jax.random.split(key, 3)

    # Binary gene-set adjacency (input_dim, n_genesets), fixed (non-trainable).
    adjacency = jax.random.bernoulli(
        k_adj, 0.3, (input_dim, n_genesets)).astype(jnp.float32)

    params = init_geneset_ae_params(
        k_par, input_dim, n_genesets, hidden_dims, latent_dim, adjacency)

    # Static prep: fold all BNs, pack weights (bf16) + biases/affine (f32) slabs.
    plan, w_slab, vec_slab = prepare_fused(params, hidden_dims,
                                           mxu_dtype=jnp.bfloat16)

    x = jax.random.normal(k_x, (batch, input_dim), jnp.float32)

    out = geneset_ae_forward(plan, w_slab, vec_slab, x)
    out = jax.tree_util.tree_map(jax.block_until_ready, out)

    # 1) Tight check vs. an exact jnp mirror of the fused bf16-operand compute
    #    (catches any kernel packing/indexing bug).
    mirror = fused_forward_ref(plan, w_slab, vec_slab, x)
    for name, _, _ in plan["out_plan"]:
        err = float(jnp.max(jnp.abs(out[name] - mirror[name])))
        assert err < 5e-4, f"{name} kernel-vs-mirror mismatch: {err}"

    # 2) Looser check vs. the unfolded f32 reference (bf16 matmul operands with
    #    f32 accumulation introduce small, chained rounding as flagged in review).
    ref = geneset_ae_forward_ref(params, x, hidden_dims)
    for name, _, _ in plan["out_plan"]:
        assert out[name].shape == ref[name].shape, name
        err = float(jnp.max(jnp.abs(out[name] - ref[name])))
        tol = 5e-2 * max(1.0, float(jnp.max(jnp.abs(ref[name]))))
        assert err < tol, f"{name} vs f32 reference: err={err} tol={tol}"

    assert out["recons"].shape == (batch, input_dim)
    assert out["latents"].shape == (batch, latent_dim)
    assert out["geneset_activities"].shape == (batch, n_genesets)
    assert out["decoded_geneset_activities"].shape == (batch, n_genesets)

    print("KERNEL_OK")
</pallas_src>

<mosaic_0001>
module attributes {stable_mosaic.version = 11 : i64} {
  func.func @kernel(%arg0: memref<8x32xf32, #tpu.memory_space<vmem>>, %arg1: memref<320x128xbf16, #tpu.memory_space<vmem>>, %arg2: memref<16x128xf32, #tpu.memory_space<vmem>>, %arg3: memref<8x128xf32, #tpu.memory_space<vmem>>) attributes {dimension_semantics = [], scalar_prefetch = 0 : i64, scratch_operands = 0 : i64, tpu.core_type = #tpu.core_type<tc>} {
    %cst = arith.constant 0.000000e+00 : f32
    %0 = vector.broadcast %cst : f32 to vector<8x128xf32>
    %c0 = arith.constant 0 : index
    %c0_0 = arith.constant 0 : index
    %1 = vector.load %arg3[%c0, %c0_0] : memref<8x128xf32, #tpu.memory_space<vmem>>, vector<8x128xf32>
    tpu.vector_store %arg3[%c0, %c0_0], %0 {strides = array<i32>} : memref<8x128xf32, #tpu.memory_space<vmem>>, vector<8x128xf32>,
    %c0_1 = arith.constant 0 : index
    %c0_2 = arith.constant 0 : index
    %2 = vector.load %arg0[%c0_1, %c0_2] : memref<8x32xf32, #tpu.memory_space<vmem>>, vector<8x32xf32>
    %c0_3 = arith.constant 0 : index
    %c0_4 = arith.constant 0 : index
    %3 = vector.load %arg1[%c0_3, %c0_4] : memref<320x128xbf16, #tpu.memory_space<vmem>>, vector<32x128xbf16>
    %4 = arith.truncf %2 : vector<8x32xf32> to vector<8x32xbf16>
    %cst_5 = arith.constant dense<0.000000e+00> : vector<8x128xf32>
    %5 = tpu.matmul %4, %3, %cst_5 {dimension_numbers = #tpu.dot_dimension_numbers<[1], [0], [0], [1], [0, 0, 1, 1], [], []>} : vector<8x32xbf16>, vector<32x128xbf16>, vector<8x128xf32> -> vector<8x128xf32>
    %c0_6 = arith.constant 0 : index
    %c0_7 = arith.constant 0 : index
    %6 = vector.load %arg2[%c0_6, %c0_7] : memref<16x128xf32, #tpu.memory_space<vmem>>, vector<1x128xf32>
    %7 = vector.broadcast %6 : vector<1x128xf32> to vector<8x128xf32>
    %8 = arith.addf %5, %7 : vector<8x128xf32>
    %cst_8 = arith.constant 0.000000e+00 : f32
    %9 = vector.broadcast %cst_8 : f32 to vector<8x128xf32>
    %10 = arith.maximumf %8, %9 : vector<8x128xf32>
    %11 = vector.extract_strided_slice %10 {offsets = [0, 0], sizes = [8, 16], strides = [1, 1]} : vector<8x128xf32> to vector<8x16xf32>
    %c0_9 = arith.constant 0 : index
    %c64 = arith.constant 64 : index
    %12 = vector.load %arg3[%c0_9, %c64] : memref<8x128xf32, #tpu.memory_space<vmem>>, vector<8x16xf32>
    tpu.vector_store %arg3[%c0_9, %c64], %11 {strides = array<i32>} : memref<8x128xf32, #tpu.memory_space<vmem>>, vector<8x16xf32>,
    %c32 = arith.constant 32 : index
    %c0_10 = arith.constant 0 : index
    %13 = vector.load %arg1[%c32, %c0_10] : memref<320x128xbf16, #tpu.memory_space<vmem>>, vector<16x128xbf16>
    %14 = vector.extract_strided_slice %10 {offsets = [0, 0], sizes = [8, 16], strides = [1, 1]} : vector<8x128xf32> to vector<8x16xf32>
    %15 = arith.truncf %14 : vector<8x16xf32> to vector<8x16xbf16>
    %cst_11 = arith.constant dense<0.000000e+00> : vector<8x128xf32>
    %16 = tpu.matmul %15, %13, %cst_11 {dimension_numbers = #tpu.dot_dimension_numbers<[1], [0], [0], [1], [0, 0, 1, 1], [], []>} : vector<8x16xbf16>, vector<16x128xbf16>, vector<8x128xf32> -> vector<8x128xf32>
    %c1 = arith.constant 1 : index
    %c0_12 = arith.constant 0 : index
    %17 = vector.load %arg2[%c1, %c0_12] : memref<16x128xf32, #tpu.memory_space<vmem>>, vector<1x128xf32>
    %18 = vector.broadcast %17 : vector<1x128xf32> to vector<8x128xf32>
    %19 = arith.addf %16, %18 : vector<8x128xf32>
    %cst_13 = arith.constant 0.000000e+00 : f32
    %20 = vector.broadcast %cst_13 : f32 to vector<8x128xf32>
    %21 = arith.maximumf %19, %20 : vector<8x128xf32>
    %c48 = arith.constant 48 : index
    %c0_14 = arith.constant 0 : index
    %22 = vector.load %arg1[%c48, %c0_14] : memref<320x128xbf16, #tpu.memory_space<vmem>>, vector<64x128xbf16>
    %23 = vector.extract_strided_slice %21 {offsets = [0, 0], sizes = [8, 64], strides = [1, 1]} : vector<8x128xf32> to vector<8x64xf32>
    %24 = arith.truncf %23 : vector<8x64xf32> to vector<8x64xbf16>
    %cst_15 = arith.constant dense<0.000000e+00> : vector<8x128xf32>
    %25 = tpu.matmul %24, %22, %cst_15 {dimension_numbers = #tpu.dot_dimension_numbers<[1], [0], [0], [1], [0, 0, 1, 1], [], []>} : vector<8x64xbf16>, vector<64x128xbf16>, vector<8x128xf32> -> vector<8x128xf32>
    %c2 = arith.constant 2 : index
    %c0_16 = arith.constant 0 : index
    %26 = vector.load %arg2[%c2, %c0_16] : memref<16x128xf32, #tpu.memory_space<vmem>>, vector<1x128xf32>
    %27 = vector.broadcast %26 : vector<1x128xf32> to vector<8x128xf32>
    %28 = arith.addf %25, %27 : vector<8x128xf32>
    %cst_17 = arith.constant 0.000000e+00 : f32
    %29 = vector.broadcast %cst_17 : f32 to vector<8x128xf32>
    %30 = arith.maximumf %28, %29 : vector<8x128xf32>
    %c112 = arith.constant 112 : index
    %c0_18 = arith.constant 0 : index
    %31 = vector.load %arg1[%c112, %c0_18] : memref<320x128xbf16, #tpu.memory_space<vmem>>, vector<48x128xbf16>
    %32 = vector.extract_strided_slice %30 {offsets = [0, 0], sizes = [8, 48], strides = [1, 1]} : vector<8x128xf32> to vector<8x48xf32>
    %33 = arith.truncf %32 : vector<8x48xf32> to vector<8x48xbf16>
    %cst_19 = arith.constant dense<0.000000e+00> : vector<8x128xf32>
    %34 = tpu.matmul %33, %31, %cst_19 {dimension_numbers = #tpu.dot_dimension_numbers<[1], [0], [0], [1], [0, 0, 1, 1], [], []>} : vector<8x48xbf16>, vector<48x128xbf16>, vector<8x128xf32> -> vector<8x128xf32>
    %c3 = arith.constant 3 : index
    %c0_20 = arith.constant 0 : index
    %35 = vector.load %arg2[%c3, %c0_20] : memref<16x128xf32, #tpu.memory_space<vmem>>, vector<1x128xf32>
    %36 = vector.broadcast %35 : vector<1x128xf32> to vector<8x128xf32>
    %37 = arith.addf %34, %36 : vector<8x128xf32>
    %c4 = arith.constant 4 : index
    %c0_21 = arith.constant 0 : index
    %38 = vector.load %arg2[%c4, %c0_21] : memref<16x128xf32, #tpu.memory_space<vmem>>, vector<1x128xf32>
    %39 = vector.broadcast %38 : vector<1x128xf32> to vector<8x128xf32>
    %40 = arith.mulf %37, %39 : vector<8x128xf32>
    %c5 = arith.constant 5 : index
    %c0_22 = arith.constant 0 : index
    %41 = vector.load %arg2[%c5, %c0_22] : memref<16x128xf32, #tpu.memory_space<vmem>>, vector<1x128xf32>
    %42 = vector.broadcast %41 : vector<1x128xf32> to vector<8x128xf32>
    %43 = arith.addf %40, %42 : vector<8x128xf32>
    %44 = vector.extract_strided_slice %43 {offsets = [0, 0], sizes = [8, 32], strides = [1, 1]} : vector<8x128xf32> to vector<8x32xf32>
    %c0_23 = arith.constant 0 : index
    %c32_24 = arith.constant 32 : index
    %45 = vector.load %arg3[%c0_23, %c32_24] : memref<8x128xf32, #tpu.memory_space<vmem>>, vector<8x32xf32>
    tpu.vector_store %arg3[%c0_23, %c32_24], %44 {strides = array<i32>} : memref<8x128xf32, #tpu.memory_space<vmem>>, vector<8x32xf32>,
    %c160 = arith.constant 160 : index
    %c0_25 = arith.constant 0 : index
    %46 = vector.load %arg1[%c160, %c0_25] : memref<320x128xbf16, #tpu.memory_space<vmem>>, vector<32x128xbf16>
    %47 = vector.extract_strided_slice %43 {offsets = [0, 0], sizes = [8, 32], strides = [1, 1]} : vector<8x128xf32> to vector<8x32xf32>
    %48 = arith.truncf %47 : vector<8x32xf32> to vector<8x32xbf16>
    %cst_26 = arith.constant dense<0.000000e+00> : vector<8x128xf32>
    %49 = tpu.matmul %48, %46, %cst_26 {dimension_numbers = #tpu.dot_dimension_numbers<[1], [0], [0], [1], [0, 0, 1, 1], [], []>} : vector<8x32xbf16>, vector<32x128xbf16>, vector<8x128xf32> -> vector<8x128xf32>
    %c6 = arith.constant 6 : index
    %c0_27 = arith.constant 0 : index
    %50 = vector.load %arg2[%c6, %c0_27] : memref<16x128xf32, #tpu.memory_space<vmem>>, vector<1x128xf32>
    %51 = vector.broadcast %50 : vector<1x128xf32> to vector<8x128xf32>
    %52 = arith.addf %49, %51 : vector<8x128xf32>
    %cst_28 = arith.constant 0.000000e+00 : f32
    %53 = vector.broadcast %cst_28 : f32 to vector<8x128xf32>
    %54 = arith.maximumf %52, %53 : vector<8x128xf32>
    %c192 = arith.constant 192 : index
    %c0_29 = arith.constant 0 : index
    %55 = vector.load %arg1[%c192, %c0_29] : memref<320x128xbf16, #tpu.memory_space<vmem>>, vector<48x128xbf16>
    %56 = vector.extract_strided_slice %54 {offsets = [0, 0], sizes = [8, 48], strides = [1, 1]} : vector<8x128xf32> to vector<8x48xf32>
    %57 = arith.truncf %56 : vector<8x48xf32> to vector<8x48xbf16>
    %cst_30 = arith.constant dense<0.000000e+00> : vector<8x128xf32>
    %58 = tpu.matmul %57, %55, %cst_30 {dimension_numbers = #tpu.dot_dimension_numbers<[1], [0], [0], [1], [0, 0, 1, 1], [], []>} : vector<8x48xbf16>, vector<48x128xbf16>, vector<8x128xf32> -> vector<8x128xf32>
    %c7 = arith.constant 7 : index
    %c0_31 = arith.constant 0 : index
    %59 = vector.load %arg2[%c7, %c0_31] : memref<16x128xf32, #tpu.memory_space<vmem>>, vector<1x128xf32>
    %60 = vector.broadcast %59 : vector<1x128xf32> to vector<8x128xf32>
    %61 = arith.addf %58, %60 : vector<8x128xf32>
    %cst_32 = arith.constant 0.000000e+00 : f32
    %62 = vector.broadcast %cst_32 : f32 to vector<8x128xf32>
    %63 = arith.maximumf %61, %62 : vector<8x128xf32>
    %c240 = arith.constant 240 : index
    %c0_33 = arith.constant 0 : index
    %64 = vector.load %arg1[%c240, %c0_33] : memref<320x128xbf16, #tpu.memory_space<vmem>>, vector<64x128xbf16>
    %65 = vector.extract_strided_slice %63 {offsets = [0, 0], sizes = [8, 64], strides = [1, 1]} : vector<8x128xf32> to vector<8x64xf32>
    %66 = arith.truncf %65 : vector<8x64xf32> to vector<8x64xbf16>
    %cst_34 = arith.constant dense<0.000000e+00> : vector<8x128xf32>
    %67 = tpu.matmul %66, %64, %cst_34 {dimension_numbers = #tpu.dot_dimension_numbers<[1], [0], [0], [1], [0, 0, 1, 1], [], []>} : vector<8x64xbf16>, vector<64x128xbf16>, vector<8x128xf32> -> vector<8x128xf32>
    %c8 = arith.constant 8 : index
    %c0_35 = arith.constant 0 : index
    %68 = vector.load %arg2[%c8, %c0_35] : memref<16x128xf32, #tpu.memory_space<vmem>>, vector<1x128xf32>
    %69 = vector.broadcast %68 : vector<1x128xf32> to vector<8x128xf32>
    %70 = arith.addf %67, %69 : vector<8x128xf32>
    %cst_36 = arith.constant 0.000000e+00 : f32
    %71 = vector.broadcast %cst_36 : f32 to vector<8x128xf32>
    %72 = arith.maximumf %70, %71 : vector<8x128xf32>
    %73 = vector.extract_strided_slice %72 {offsets = [0, 0], sizes = [8, 16], strides = [1, 1]} : vector<8x128xf32> to vector<8x16xf32>
    %c0_37 = arith.constant 0 : index
    %c80 = arith.constant 80 : index
    %74 = vector.load %arg3[%c0_37, %c80] : memref<8x128xf32, #tpu.memory_space<vmem>>, vector<8x16xf32>
    tpu.vector_store %arg3[%c0_37, %c80], %73 {strides = array<i32>} : memref<8x128xf32, #tpu.memory_space<vmem>>, vector<8x16xf32>,
    %c304 = arith.constant 304 : index
    %c0_38 = arith.constant 0 : index
    %75 = vector.load %arg1[%c304, %c0_38] : memref<320x128xbf16, #tpu.memory_space<vmem>>, vector<16x128xbf16>
    %76 = vector.extract_strided_slice %72 {offsets = [0, 0], sizes = [8, 16], strides = [1, 1]} : vector<8x128xf32> to vector<8x16xf32>
    %77 = arith.truncf %76 : vector<8x16xf32> to vector<8x16xbf16>
    %cst_39 = arith.constant dense<0.000000e+00> : vector<8x128xf32>
    %78 = tpu.matmul %77, %75, %cst_39 {dimension_numbers = #tpu.dot_dimension_numbers<[1], [0], [0], [1], [0, 0, 1, 1], [], []>} : vector<8x16xbf16>, vector<16x128xbf16>, vector<8x128xf32> -> vector<8x128xf32>
    %c9 = arith.constant 9 : index
    %c0_40 = arith.constant 0 : index
    %79 = vector.load %arg2[%c9, %c0_40] : memref<16x128xf32, #tpu.memory_space<vmem>>, vector<1x128xf32>
    %80 = vector.broadcast %79 : vector<1x128xf32> to vector<8x128xf32>
    %81 = arith.addf %78, %80 : vector<8x128xf32>
    %82 = vector.extract_strided_slice %81 {offsets = [0, 0], sizes = [8, 32], strides = [1, 1]} : vector<8x128xf32> to vector<8x32xf32>
    %c0_41 = arith.constant 0 : index
    %c0_42 = arith.constant 0 : index
    %83 = vector.load %arg3[%c0_41, %c0_42] : memref<8x128xf32, #tpu.memory_space<vmem>>, vector<8x32xf32>
    tpu.vector_store %arg3[%c0_41, %c0_42], %82 {strides = array<i32>} : memref<8x128xf32, #tpu.memory_space<vmem>>, vector<8x32xf32>,
    return
  }
}

</mosaic_0001>

<bundles_post_ra>
// kernel: tpu_custom_call.1
= control target key start
LH: loop header
LB: loop body
LE: loop exit
PB: predicated region body
PF: predicated region fallthrough
CT: control target
= control target key end

     0   :  { %8 = vsyncpa [#allocation3], 0  ;;  %s1015_s0 = inlined_call_operand.hbm [shape: f32[8,32], index: 0, kind: input, shape index: {}]   ;;  %s1016_s1 = inlined_call_operand.hbm [shape: bf16[320,128], index: 1, kind: input, shape index: {}]   ;;  %s1017_s2 = inlined_call_operand.hbm [shape: f32[16,128], index: 2, kind: input, shape index: {}]   ;;  %s1018_s3 = inlined_call_operand.hbm [shape: f32[8,128], index: 3, kind: output, shape index: {}]  }
   0x1   :  { %9 = vsyncpa [#allocation6], 0 }
   0x2   :  { %10 = vsyncpa [#allocation4], 0  ;;  %s922_s12 = smov [#allocation5]  }
   0x3   :  { %s26_s13 = sshll.u32 %s922_s12, 4  ;;  %s27_s13 = int_to_ptr.vmem [resolvable:$true] %s26_s13 }
   0x4   :  { %s844_s14 = scalar_lea.vmem %s27_s13, 2560  ;;  %p849_p1 = scmp.lt.s32.totalorder %s27_s13, %s27_s13 }
   0x5   :  { %p845_p0 = scmp.ne.s32.totalorder %s27_s13, %s844_s14  ;;  %p850_p2 = scmp.lt.s32.totalorder %s844_s14, %s844_s14 }
   0x7   :  { %p851_p3 = por %p850_p2, %p849_p1 }
   0x9   :  { %p852_p4 = pnand %p851_p3, %p845_p0 }
   0xb   :  { %855 = shalt.err (!%p852_p4)
}
   0xc   :  { %s923_s15 = smov 64   ;;  %s924_s16 = smov 4  }
   0xd   :  { %32 = dma.hbm_to_vmem [thread:$0]  %s1016_s1, 2560, %s27_s13, [#allocation6], %s923_s15, %s923_s15, %s924_s16  }
   0xe   :  { %s925_s19 = smov [#allocation2]   ;;  %s926_s21 = smov [#allocation7]  }
   0xf   :  { %s17_s20 = sshll.u32 %s925_s19, 4  ;;  %s38_s22 = sshll.u32 %s926_s21, 4  ;;  %s18_s20 = int_to_ptr.vmem [resolvable:$true] %s17_s20  ;;  %s39_s22 = int_to_ptr.vmem [resolvable:$true] %s38_s22 }
  0x10   :  { %s864_s23 = scalar_lea.vmem %s18_s20, 128  ;;  %p869_p6 = scmp.lt.s32.totalorder %s18_s20, %s18_s20 }
  0x11   :  { %p865_p5 = scmp.ne.s32.totalorder %s18_s20, %s864_s23  ;;  %p870_p7 = scmp.lt.s32.totalorder %s864_s23, %s864_s23 }
  0x13   :  { %p871_p8 = por %p870_p7, %p869_p6 }
  0x15   :  { %p872_p9 = pnand %p871_p8, %p865_p5 }
  0x17   :  { %875 = shalt.err (!%p872_p9)
}
  0x18   :  { %20 = dma.hbm_to_vmem [thread:$0]  %s1015_s0, 128, %s18_s20, [#allocation3]  }
  0x19   :  { %s884_s26 = scalar_lea.vmem %s39_s22, 256  ;;  %p889_p11 = scmp.lt.s32.totalorder %s39_s22, %s39_s22 }
  0x1a   :  { %p885_p10 = scmp.ne.s32.totalorder %s39_s22, %s884_s26  ;;  %p890_p12 = scmp.lt.s32.totalorder %s884_s26, %s884_s26 }
  0x1c   :  { %p891_p13 = por %p890_p12, %p889_p11 }
  0x1e   :  { %p892_p0 = pnand %p891_p13, %p885_p10 }
  0x20   :  { %895 = shalt.err (!%p892_p0)
}
  0x21   :  { %s927_s1 = smov 128   ;;  %s928_s27 = smov 8  }
  0x22   :  { %44 = dma.hbm_to_vmem [thread:$0]  %s1017_s2, 256, %s39_s22, [#allocation6], %s927_s1, %s927_s1, %s928_s27  }
  0x23   :  { %916 = dma.done.wait [#allocation3], 128  }
  0x24   :  { %917 = vsyncadd [#allocation3], 4294967168 }
  0x25   :  { %918 = dma.done.wait [#allocation6], 2816  }
  0x26   :  { %919 = vsyncadd [#allocation6], 4294964480  ;;  %v929_v0 = vmov 0.0   ;;  %vm930_vm0 = vmmov 0   ;;  %v816_v1 = vld [vmem:[#allocation5 + $0x8] sm:$0xff]   ;;  %v817_v2 = vld [vmem:[#allocation5] sm:$0xff]  }
  0x27   :  { %732 = vmatprep.subr.bf16.mxu0 %v929_v0  ;;  %55 = vst [vmem:[#allocation8] sm:$0xff] %v929_v0  ;;  %736 = vmatprep.mubr.msk.bf16.mxu0 %vm930_vm0, %v929_v0  ;;  %v56_v3 = vld [vmem:[#allocation2] sm:$0xff]  ;;  %vm79_vm1 = vcmask 261120   ;;  %v818_v5 = vld [vmem:[#allocation5 + $0x10] sm:$0xff]   ;;  %v666_v6 = vld [vmem:[#allocation7] ss:$0 sm:$0xff] }
  0x28   :  { %740 = vmatprep.subr.bf16.mxu1 %v929_v0  ;;  %742 = vmatprep.mubr.msk.bf16.mxu1 %vm930_vm0, %v929_v0  ;;  %v61_v4 = vpack.c.bf16 %v56_v3, %v56_v3  ;;  %vm144_vm2 = vcmask 130048   ;;  %v819_v12 = vld [vmem:[#allocation5 + $0x30] sm:$0xff]   ;;  %v820_v15 = vld [vmem:[#allocation5 + $0x28] sm:$0xff]   ;;  %v821_v16 = vld [vmem:[#allocation5 + $0x20] sm:$0xff]   ;;  %vm128_vm3 = vcmask 654848   ;;  %vm227_vm4 = vcmask 523264  }
  0x29   :  { %733 = vmatpush3.bf16.msra.mxu0 %v816_v1  ;;  %741 = vmatpush3.bf16.msra.mxu1 %v818_v5  ;;  %v822_v17 = vld [vmem:[#allocation5 + $0x18] sm:$0xff]   ;;  %v823_v18 = vld [vmem:[#allocation5 + $0x48] sm:$0xff]   ;;  %v670_v20 = vld [vmem:[#allocation7 + $0x1] ss:$0 sm:$0xff]  ;;  %vm302_vm5 = vcmask 392192   ;;  %s931_s0 = smov 32  }
  0x2a   :  { %734 = vmatprep.subr.bf16.mxu0 %v929_v0  ;;  %746 = vmatprep.subr.bf16.mxu1 %v929_v0  ;;  %v824_v28 = vld [vmem:[#allocation5 + $0x40] sm:$0xff]   ;;  %v825_v29 = vld [vmem:[#allocation5 + $0x38] sm:$0xff]   ;;  %v827_v39 = vld [vmem:[#allocation5 + $0x50] sm:$0xff]   ;;  %vm362_vm6 = vcmask 523520   ;;  %s932_s2 = smov 80   ;;  %vm590_vm7 = vcmask 786048  }
  0x2b   :  { %v673_v30 = vld [vmem:[#allocation7 + $0x2] ss:$0 sm:$0xff]  ;;  %v826_v38 = vld [vmem:[#allocation5 + $0x58] sm:$0xff]   ;;  %v828_v40 = vld [vmem:[#allocation5 + $0x70] sm:$0xff]   ;;  %s933_s30 = smov [#allocation8]  }
  0x2c   :  { %v679_v41 = vld [vmem:[#allocation7 + $0x3] ss:$0 sm:$0xff]  ;;  %v684_v43 = vld [vmem:[#allocation7 + $0x4] ss:$0 sm:$0xff]  ;;  %v685_v46 = vld [vmem:[#allocation7 + $0x5] ss:$0 sm:$0xff] }
  0x2d   :  { %735 = vmatpush3.bf16.msra.mxu0 %v817_v2  ;;  %v829_v52 = vld [vmem:[#allocation5 + $0x68] sm:$0xff]   ;;  %v830_v53 = vld [vmem:[#allocation5 + $0x60] sm:$0xff]   ;;  %v831_v54 = vld [vmem:[#allocation5 + $0x90] sm:$0xff]   ;;  %s656_s4 = sshll.u32 %s933_s30, 4  ;;  %s657_s4 = int_to_ptr.vmem [resolvable:$true] %s656_s4 }
  0x2e   :  { %758 = vmatprep.subr.bf16.mxu0 %v929_v0  ;;  %v832_v55 = vld [vmem:[#allocation5 + $0x88] sm:$0xff]   ;;  %v686_v57 = vld [vmem:[#allocation7 + $0x6] ss:$0 sm:$0xff]  ;;  %v834_v3 = vld [vmem:[#allocation5 + $0x78] sm:$0xff]   ;;  %s896_s5 = scalar_lea.vmem %s657_s4, 128  ;;  %p901_p2 = scmp.lt.s32.totalorder %s657_s4, %s657_s4 }
  0x2f   :  { %v833_v2 = vld [vmem:[#allocation5 + $0x80] sm:$0xff]   ;;  %p897_p1 = scmp.ne.s32.totalorder %s657_s4, %s896_s5  ;;  %p902_p3 = scmp.lt.s32.totalorder %s896_s5, %s896_s5 }
  0x30   :  { %737 = vmatmul.mubr.msk.bf16.vlgmr.msra.gmra.mxu0 %vm79_vm1, %v61_v4  ;;  %v835_v4 = vld [vmem:[#allocation5 + $0x98] sm:$0xff]   ;;  %v690_v5 = vld [vmem:[#allocation7 + $0x7] ss:$0 sm:$0xff] }
  0x31   :  { %764 = vmatprep.mubr.msk.bf16.mxu0 %vm930_vm0, %v929_v0  ;;  %759 = vmatpush3.bf16.msra.mxu0 %v823_v18  ;;  %p903_p4 = por %p902_p3, %p901_p2 }
  0x32   :  { %760 = vmatprep.subr.bf16.mxu0 %v929_v0 }
  0x33   :  { %p904_p5 = pnand %p903_p4, %p897_p1 }
  0x35   :  { %761 = vmatpush3.bf16.msra.mxu0 %v824_v28 }
  0x36   :  { %762 = vmatprep.subr.bf16.mxu0 %v929_v0 }
  0x39   :  { %763 = vmatpush3.bf16.msra.mxu0 %v825_v29 }
  0x3a   :  { %768 = vmatprep.subr.bf16.mxu0 %v929_v0 }
  0xf0   :  { %v117_v7 = vpop.f32.mrf.mxu0 }
  0xf1   :  { %v118_v8 = vadd.f32 %v666_v6, %v117_v7 }
  0xf2   :  { %v738_v9 = vpop.f32.mrf.mxu0 }
  0xf3   :  { %v123_v10 = vmax.f32 %v118_v8, 0.0 }
  0xf4   :  { %v120_v11 = vpop.f32.mrf.mxu0 }
  0xf5   :  { %v132_v13 = vpack.c.bf16 %v123_v10, %v123_v10  ;;  %125 = vrot.lane.b32.xlu0 %v123_v10, %s923_s15 }
  0xf6   :  { %v739_v14 = vpop.f32.mrf.mxu0 }
  0xf7   :  { %743 = vmatmul.mubr.msk.bf16.vlgmr.msra.gmra.mxu1 %vm144_vm2, %v132_v13  ;;  %v695_v13 = vld [vmem:[#allocation7 + $0x8] ss:$0 sm:$0xff] }
  0xf8   :  { %747 = vmatpush3.bf16.msra.mxu1 %v819_v12  ;;  %754 = vmatprep.mubr.msk.bf16.mxu1 %vm930_vm0, %v929_v0 }
  0xf9   :  { %748 = vmatprep.subr.bf16.mxu1 %v929_v0 }
  0xfc   :  { %749 = vmatpush3.bf16.msra.mxu1 %v820_v15 }
  0xfd   :  { %750 = vmatprep.subr.bf16.mxu1 %v929_v0 }
 0x100   :  { %751 = vmatpush3.bf16.msra.mxu1 %v821_v16 }
 0x101   :  { %752 = vmatprep.subr.bf16.mxu1 %v929_v0 }
 0x104   :  { %753 = vmatpush3.bf16.msra.mxu1 %v822_v17 }
 0x105   :  { %776 = vmatprep.subr.bf16.mxu1 %v929_v0 }
 0x167   :  { %v126_v19 = vpop.permute.xlu0 %125 }
 0x168   :  { %129 = vst.msk [vmem:[#allocation8] sm:$0xff] %vm128_vm3, %v126_v19 }
 0x1b7   :  { %v182_v21 = vpop.f32.mrf.mxu1 }
 0x1b8   :  { %v183_v22 = vadd.f32 %v670_v20, %v182_v21  ;;  %v701_v21 = vld [vmem:[#allocation7 + $0x9] ss:$0 sm:$0xff] }
 0x1b9   :  { %v744_v23 = vpop.f32.mrf.mxu1 }
 0x1ba   :  { %v188_v24 = vmax.f32 %v183_v22, 0.0 }
 0x1bb   :  { %v185_v25 = vpop.f32.mrf.mxu1 }
 0x1bc   :  { %v197_v26 = vpack.c.bf16 %v188_v24, %v188_v24 }
 0x1bd   :  { %v745_v27 = vpop.f32.mrf.mxu1 }
 0x1be   :  { %755 = vmatmul.mubr.msk.bf16.vlgmr.msra.gmra.mxu1 %vm227_vm4, %v197_v26 }
 0x1bf   :  { %782 = vmatprep.mubr.msk.bf16.mxu1 %vm930_vm0, %v929_v0  ;;  %777 = vmatpush3.bf16.msra.mxu1 %v828_v40 }
 0x1c0   :  { %778 = vmatprep.subr.bf16.mxu1 %v929_v0 }
 0x1c3   :  { %779 = vmatpush3.bf16.msra.mxu1 %v829_v52 }
 0x1c4   :  { %780 = vmatprep.subr.bf16.mxu1 %v929_v0 }
 0x1c7   :  { %781 = vmatpush3.bf16.msra.mxu1 %v830_v53 }
 0x1c8   :  { %798 = vmatprep.subr.bf16.mxu1 %v929_v0 }
 0x27e   :  { %v265_v31 = vpop.f32.mrf.mxu1 }
 0x27f   :  { %v266_v32 = vadd.f32 %v673_v30, %v265_v31 }
 0x280   :  { %v756_v33 = vpop.f32.mrf.mxu1 }
 0x281   :  { %v271_v34 = vmax.f32 %v266_v32, 0.0 }
 0x282   :  { %v268_v35 = vpop.f32.mrf.mxu1 }
 0x283   :  { %v278_v36 = vpack.c.bf16 %v271_v34, %v271_v34 }
 0x284   :  { %v757_v37 = vpop.f32.mrf.mxu1 }
 0x285   :  { %765 = vmatmul.mubr.msk.bf16.vlgmr.msra.gmra.mxu0 %vm302_vm5, %v278_v36 }
 0x286   :  { %772 = vmatprep.mubr.msk.bf16.mxu0 %vm930_vm0, %v929_v0  ;;  %769 = vmatpush3.bf16.msra.mxu0 %v826_v38 }
 0x287   :  { %770 = vmatprep.subr.bf16.mxu0 %v929_v0 }
 0x28a   :  { %771 = vmatpush3.bf16.msra.mxu0 %v827_v39 }
 0x28b   :  { %786 = vmatprep.subr.bf16.mxu0 %v929_v0 }
 0x345   :  { %v340_v42 = vpop.f32.mrf.mxu0 }
 0x346   :  { %v341_v44 = vadd.f32 %v679_v41, %v340_v42 }
 0x347   :  { %v766_v45 = vpop.f32.mrf.mxu0 }
 0x348   :  { %v351_v47 = vmul.f32 %v684_v43, %v341_v44 }
 0x349   :  { %v343_v48 = vpop.f32.mrf.mxu0 }
 0x34a   :  { %v357_v49 = vadd.f32 %v685_v46, %v351_v47 }
 0x34b   :  { %v767_v50 = vpop.f32.mrf.mxu0 }
 0x34c   :  { %359 = vrot.lane.b32.xlu0 %v357_v49, %s931_s0  ;;  %v368_v51 = vpack.c.bf16 %v357_v49, %v357_v49 }
 0x34e   :  { %773 = vmatmul.mubr.msk.bf16.vlgmr.msra.gmra.mxu0 %vm79_vm1, %v368_v51 }
 0x34f   :  { %794 = vmatprep.mubr.msk.bf16.mxu0 %vm930_vm0, %v929_v0  ;;  %787 = vmatpush3.bf16.msra.mxu0 %v831_v54 }
 0x350   :  { %788 = vmatprep.subr.bf16.mxu0 %v929_v0 }
 0x353   :  { %789 = vmatpush3.bf16.msra.mxu0 %v832_v55 }
 0x354   :  { %790 = vmatprep.subr.bf16.mxu0 %v929_v0 }
 0x357   :  { %791 = vmatpush3.bf16.msra.mxu0 %v833_v2 }
 0x358   :  { %792 = vmatprep.subr.bf16.mxu0 %v929_v0 }
 0x35b   :  { %793 = vmatpush3.bf16.msra.mxu0 %v834_v3 }
 0x3be   :  { %v360_v56 = vpop.permute.xlu0 %359 }
 0x3bf   :  { %363 = vst.msk [vmem:[#allocation8] sm:$0xff] %vm362_vm6, %v360_v56 }
 0x40e   :  { %v423_v58 = vpop.f32.mrf.mxu0 }
 0x40f   :  { %v424_v59 = vadd.f32 %v686_v57, %v423_v58 }
 0x410   :  { %v774_v60 = vpop.f32.mrf.mxu0 }
 0x411   :  { %v429_v61 = vmax.f32 %v424_v59, 0.0 }
 0x412   :  { %v426_v62 = vpop.f32.mrf.mxu0 }
 0x413   :  { %v436_v63 = vpack.c.bf16 %v429_v61, %v429_v61 }
 0x414   :  { %v775_v1 = vpop.f32.mrf.mxu0 }
 0x415   :  { %783 = vmatmul.mubr.msk.bf16.vlgmr.msra.gmra.mxu1 %vm302_vm5, %v436_v63 }
 0x416   :  { %800 = vmatprep.mubr.msk.bf16.mxu1 %vm930_vm0, %v929_v0  ;;  %799 = vmatpush3.bf16.msra.mxu1 %v835_v4 }
 0x4d5   :  { %v497_v6 = vpop.f32.mrf.mxu1 }
 0x4d6   :  { %v498_v7 = vadd.f32 %v690_v5, %v497_v6 }
 0x4d7   :  { %v784_v8 = vpop.f32.mrf.mxu1 }
 0x4d8   :  { %v503_v9 = vmax.f32 %v498_v7, 0.0 }
 0x4d9   :  { %v500_v10 = vpop.f32.mrf.mxu1 }
 0x4da   :  { %v512_v11 = vpack.c.bf16 %v503_v9, %v503_v9 }
 0x4db   :  { %v785_v12 = vpop.f32.mrf.mxu1 }
 0x4dc   :  { %795 = vmatmul.mubr.msk.bf16.vlgmr.msra.gmra.mxu0 %vm227_vm4, %v512_v11 }
 0x59c   :  { %v579_v14 = vpop.f32.mrf.mxu0 }
 0x59d   :  { %v580_v15 = vadd.f32 %v695_v13, %v579_v14 }
 0x59e   :  { %v796_v16 = vpop.f32.mrf.mxu0 }
 0x59f   :  { %v585_v17 = vmax.f32 %v580_v15, 0.0 }
 0x5a0   :  { %v582_v0 = vpop.f32.mrf.mxu0 }
 0x5a1   :  { %v594_v18 = vpack.c.bf16 %v585_v17, %v585_v17  ;;  %587 = vrot.lane.b32.xlu1 %v585_v17, %s932_s2 }
 0x5a2   :  { %v797_v19 = vpop.f32.mrf.mxu0 }
 0x5a3   :  { %801 = vmatmul.mubr.msk.bf16.vlgmr.msra.gmra.mxu1 %vm144_vm2, %v594_v18 }
 0x613   :  { %v588_v20 = vpop.permute.xlu1 %587 }
 0x614   :  { %591 = vst.msk [vmem:[#allocation8] sm:$0xff] %vm590_vm7, %v588_v20 }
 0x663   :  { %v643_v22 = vpop.f32.mrf.mxu1 }
 0x664   :  { %v644_v23 = vadd.f32 %v701_v21, %v643_v22 }
 0x665   :  { %v802_v24 = vpop.f32.mrf.mxu1 }
 0x666   :  { %649 = vst.msk [vmem:[#allocation8] sm:$0xff] %vm79_vm1, %v644_v23 }
 0x667   :  { %v646_v25 = vpop.f32.mrf.mxu1 }
 0x668   :  { %907 = shalt.err (!%p904_p5)
}
 0x669   :  { %659 = dma.vmem_to_hbm [thread:$0]  %s657_s4, 128, %s1018_s3, [#allocation4]   ;;  %v803_v26 = vpop.f32.mrf.mxu1 }
 0x66a   :  { %920 = dma.done.wait [#allocation4], 128  }
 0x66b   :  { %921 = vsyncadd [#allocation4], 4294967168 }
 0x66c   :  { %663 = vsyncpa [#allocation3], 1 }
 0x66d   :  { %664 = vsyncpa [#allocation6], 1 }
 0x66e   :  { %665 = vsyncpa [#allocation4], 1 }

</bundles_post_ra>
